<compile_context>
chip_gen: v6e
topology: v6e:2x2x1
jax: 0.10.0
libtpu: 0.0.40
codegen_flags: <defaults>
</compile_context>

<pallas_src>
import functools

import numpy as np
import jax
import jax.numpy as jnp
from jax import lax
from jax.experimental import pallas as pl
from jax.experimental.pallas import tpu as pltpu


# ------------------------------ fused kernel -------------------------------

def _attention_kernel(x_ref, wqkv_ref, wout_ref, bout_ref, hs_ref, o_ref, *,
                      heads, dim_head, scale):
    inner = heads * dim_head
    bf16 = jnp.bfloat16

    x = x_ref[0]                                             # (N, D) f32

    # Fused bias-free QKV projection: (N, D) @ (D, 3*inner) -> (N, 3*inner)
    qkv = jnp.dot(x.astype(bf16), wqkv_ref[...].astype(bf16),
                  preferred_element_type=jnp.float32)

    ctx_parts = []
    for h in range(heads):                                   # static unroll
        q_h = qkv[:, h * dim_head:(h + 1) * dim_head]                    # (N, Dh)
        k_h = qkv[:, inner + h * dim_head: inner + (h + 1) * dim_head]   # (N, Dh)
        v_h = qkv[:, 2 * inner + h * dim_head: 2 * inner + (h + 1) * dim_head]

        # dots[n, m] = sum_d q[n, d] * k[m, d]  (contract Dh, no transpose)
        dots = lax.dot_general(
            q_h.astype(bf16), k_h.astype(bf16),
            dimension_numbers=(((1,), (1,)), ((), ())),
            preferred_element_type=jnp.float32) * scale                  # (N, N)

        # numerically-stable softmax over keys (f32; divide via EUP recip)
        m = jnp.max(dots, axis=-1, keepdims=True)
        e = jnp.exp(dots - m)
        attn = e * pl.reciprocal(jnp.sum(e, axis=-1, keepdims=True),
                                 approx=True)

        ctx_parts.append(jnp.dot(attn.astype(bf16), v_h.astype(bf16),
                                 preferred_element_type=jnp.float32))    # (N, Dh)

    # Lane-dense 'b h n d -> b n (h d)' context, then per-head drop/rescale
    # (commutes with attn@v, so it is applied to the small (N, inner) slab).
    ctx = jnp.concatenate(ctx_parts, axis=-1)                # (N, inner)
    ctx = ctx * hs_ref[...]                                  # (1, inner) broadcast

    # Output projection (to_out Linear; its Dropout is identity at p=0).
    out = jnp.dot(ctx.astype(bf16), wout_ref[...].astype(bf16),
                  preferred_element_type=jnp.float32) + bout_ref[...]
    o_ref[0] = out.astype(o_ref.dtype)


# ------------------------------ wrapper ------------------------------------

def attention_forward(x, w_qkv, w_out, b_out, head_scale, *, heads, dim_head):
    """x: (B, N, D) f32. head_scale: host numpy array of shape (heads,)."""
    B, N, D = x.shape
    inner = heads * dim_head
    scale = float(dim_head) ** -0.5

    # Per-head drop/rescale expanded to a lane-dense (1, inner) vector
    # (head h's value repeated over its Dh lanes) -- built host-side.
    hs_vec = jnp.asarray(np.repeat(np.asarray(head_scale, np.float64),
                                   dim_head)[None, :], jnp.float32)
    b_out2d = jnp.asarray(b_out, jnp.float32).reshape(1, D)

    kern = functools.partial(_attention_kernel, heads=heads,
                             dim_head=dim_head, scale=scale)
    return pl.pallas_call(
        kern,
        out_shape=jax.ShapeDtypeStruct((B, N, D), jnp.float32),
        grid=(B,),
        in_specs=[
            pl.BlockSpec((1, N, D), lambda b: (b, 0, 0)),          # x
            pl.BlockSpec((D, 3 * inner), lambda b: (0, 0)),        # w_qkv
            pl.BlockSpec((inner, D), lambda b: (0, 0)),            # w_out
            pl.BlockSpec((1, D), lambda b: (0, 0)),                # b_out
            pl.BlockSpec((1, inner), lambda b: (0, 0)),            # head scale
        ],
        out_specs=pl.BlockSpec((1, N, D), lambda b: (b, 0, 0)),
        compiler_params=pltpu.CompilerParams(
            dimension_semantics=("parallel",)),
    )(x, w_qkv, w_out, b_out2d, hs_vec)


# --------------------------- pure-JAX reference -----------------------------

def reference_attention(x, w_qkv, w_out, b_out, head_scale, heads, dim_head):
    B, N, D = x.shape
    inner = heads * dim_head
    qkv = x @ w_qkv
    q, k, v = jnp.split(qkv, 3, axis=-1)

    def to_heads(t):
        return jnp.transpose(t.reshape(B, N, heads, dim_head), (0, 2, 1, 3))

    q, k, v = map(to_heads, (q, k, v))
    dots = jnp.einsum('bhnd,bhmd->bhnm', q, k) * (float(dim_head) ** -0.5)
    attn = jax.nn.softmax(dots, axis=-1)
    attn = attn * head_scale[None, :, None, None]
    out = jnp.einsum('bhnm,bhmd->bhnd', attn, v)
    out = jnp.transpose(out, (0, 2, 1, 3)).reshape(B, N, inner)
    return out @ w_out + b_out[None, None, :]


# ---------------------------------- main ------------------------------------

if __name__ == "__main__":
    B, N = 2, 16
    DIM, HEADS, DIM_HEAD = 32, 4, 8
    INNER = HEADS * DIM_HEAD
    p = 0.1

    key = jax.random.PRNGKey(0)
    kx, kq, ko, kb = jax.random.split(key, 4)
    x = jax.random.normal(kx, (B, N, DIM), dtype=jnp.float32)
    w_qkv = 0.05 * jax.random.normal(kq, (DIM, 3 * INNER), jnp.float32)
    w_out = 0.05 * jax.random.normal(ko, (INNER, DIM), jnp.float32)
    b_out = 0.05 * jax.random.normal(kb, (DIM,), jnp.float32)

    # Host-side per-head drop mask, mirroring the reference's np.random.binomial
    # (keep head i iff a[i]==1, rescale by heads / sum(a)).  Deterministic seed.
    rng = np.random.RandomState(0)
    a = rng.binomial(1, 1.0 - p, size=HEADS)
    while a.sum() == 0:
        a = rng.binomial(1, 1.0 - p, size=HEADS)
    head_scale = a.astype(np.float64) * HEADS / a.sum()
    # TODO(synk): nn.Dropout on attn / to_out has p=0.0 (identity); train-mode
    # dropout and the self.attentionmap side-attribute are not materialized.

    out = attention_forward(x, w_qkv, w_out, b_out, head_scale,
                            heads=HEADS, dim_head=DIM_HEAD)
    out = jax.block_until_ready(out)

    ref = reference_attention(x, w_qkv, w_out, b_out,
                              jnp.asarray(head_scale, jnp.float32),
                              HEADS, DIM_HEAD)
    err = float(jnp.max(jnp.abs(out - ref)))

    assert out.shape == (B, N, DIM)
    assert bool(jnp.all(jnp.isfinite(out)))
    assert err < 3e-2, f"mismatch vs reference: max abs err = {err}"
    print("KERNEL_OK")
</pallas_src>

<mosaic_0001>
module attributes {stable_mosaic.version = 11 : i64} {
  func.func @_attention_kernel(%arg0: i32, %arg1: memref<1x16x32xf32, #tpu.memory_space<vmem>>, %arg2: memref<32x96xf32, #tpu.memory_space<vmem>>, %arg3: memref<32x32xf32, #tpu.memory_space<vmem>>, %arg4: memref<1x32xf32, #tpu.memory_space<vmem>>, %arg5: memref<1x32xf32, #tpu.memory_space<vmem>>, %arg6: memref<1x16x32xf32, #tpu.memory_space<vmem>>) attributes {dimension_semantics = [#tpu.dimension_semantics<parallel>], iteration_bounds = array<i64: 2>, scalar_prefetch = 0 : i64, scratch_operands = 0 : i64, tpu.core_type = #tpu.core_type<tc>, window_params = [{transform_indices = @transform_0, window_bounds = array<i64: 1, 16, 32>}, {pipeline_mode = #tpu.pipeline_mode<synchronous>, transform_indices = @transform_1, window_bounds = array<i64: 32, 96>}, {pipeline_mode = #tpu.pipeline_mode<synchronous>, transform_indices = @transform_2, window_bounds = array<i64: 32, 32>}, {pipeline_mode = #tpu.pipeline_mode<synchronous>, transform_indices = @transform_3, window_bounds = array<i64: 1, 32>}, {pipeline_mode = #tpu.pipeline_mode<synchronous>, transform_indices = @transform_4, window_bounds = array<i64: 1, 32>}, {transform_indices = @transform_5, window_bounds = array<i64: 1, 16, 32>}]} {
    %c0 = arith.constant 0 : index
    %c0_0 = arith.constant 0 : index
    %c0_1 = arith.constant 0 : index
    %0 = vector.load %arg1[%c0, %c0_0, %c0_1] : memref<1x16x32xf32, #tpu.memory_space<vmem>>, vector<1x16x32xf32>
    %1 = vector.shape_cast %0 : vector<1x16x32xf32> to vector<16x32xf32>
    %2 = arith.truncf %1 : vector<16x32xf32> to vector<16x32xbf16>
    %c0_2 = arith.constant 0 : index
    %c0_3 = arith.constant 0 : index
    %3 = vector.load %arg2[%c0_2, %c0_3] : memref<32x96xf32, #tpu.memory_space<vmem>>, vector<32x96xf32>
    %4 = arith.truncf %3 : vector<32x96xf32> to vector<32x96xbf16>
    %cst = arith.constant dense<0.000000e+00> : vector<16x96xf32>
    %5 = tpu.matmul %2, %4, %cst {dimension_numbers = #tpu.dot_dimension_numbers<[1], [0], [0], [1], [0, 0, 1, 1], [], []>} : vector<16x32xbf16>, vector<32x96xbf16>, vector<16x96xf32> -> vector<16x96xf32>
    %6 = vector.extract_strided_slice %5 {offsets = [0, 0], sizes = [16, 8], strides = [1, 1]} : vector<16x96xf32> to vector<16x8xf32>
    %7 = vector.extract_strided_slice %5 {offsets = [0, 32], sizes = [16, 8], strides = [1, 1]} : vector<16x96xf32> to vector<16x8xf32>
    %8 = vector.extract_strided_slice %5 {offsets = [0, 64], sizes = [16, 8], strides = [1, 1]} : vector<16x96xf32> to vector<16x8xf32>
    %9 = arith.truncf %6 : vector<16x8xf32> to vector<16x8xbf16>
    %10 = arith.truncf %7 : vector<16x8xf32> to vector<16x8xbf16>
    %cst_4 = arith.constant dense<0.000000e+00> : vector<16x16xf32>
    %11 = tpu.matmul %9, %10, %cst_4 {dimension_numbers = #tpu.dot_dimension_numbers<[1], [1], [0], [0], [0, 0, 1, 0], [], []>} : vector<16x8xbf16>, vector<16x8xbf16>, vector<16x16xf32> -> vector<16x16xf32>
    %cst_5 = arith.constant 0.353553385 : f32
    %12 = vector.broadcast %cst_5 : f32 to vector<16x16xf32>
    %13 = arith.mulf %11, %12 : vector<16x16xf32>
    %cst_6 = arith.constant dense<0xFF800000> : vector<16xf32>
    %14 = vector.multi_reduction <maximumf>, %13, %cst_6 [1] : vector<16x16xf32> to vector<16xf32>
    %15 = vector.shape_cast %14 : vector<16xf32> to vector<16x1xf32>
    %16 = vector.broadcast %15 : vector<16x1xf32> to vector<16x16xf32>
    %17 = arith.subf %13, %16 : vector<16x16xf32>
    %18 = math.exp %17 : vector<16x16xf32>
    %cst_7 = arith.constant dense<0.000000e+00> : vector<16xf32>
    %19 = vector.multi_reduction <add>, %18, %cst_7 [1] : vector<16x16xf32> to vector<16xf32>
    %20 = vector.shape_cast %19 : vector<16xf32> to vector<16x1xf32>
    %21 = tpu.reciprocal %20 {approx = true} : vector<16x1xf32> -> vector<16x1xf32>
    %22 = vector.broadcast %21 : vector<16x1xf32> to vector<16x16xf32>
    %23 = arith.mulf %18, %22 : vector<16x16xf32>
    %24 = arith.truncf %23 : vector<16x16xf32> to vector<16x16xbf16>
    %25 = arith.truncf %8 : vector<16x8xf32> to vector<16x8xbf16>
    %cst_8 = arith.constant dense<0.000000e+00> : vector<16x8xf32>
    %26 = tpu.matmul %24, %25, %cst_8 {dimension_numbers = #tpu.dot_dimension_numbers<[1], [0], [0], [1], [0, 0, 1, 1], [], []>} : vector<16x16xbf16>, vector<16x8xbf16>, vector<16x8xf32> -> vector<16x8xf32>
    %27 = vector.extract_strided_slice %5 {offsets = [0, 8], sizes = [16, 8], strides = [1, 1]} : vector<16x96xf32> to vector<16x8xf32>
    %28 = vector.extract_strided_slice %5 {offsets = [0, 40], sizes = [16, 8], strides = [1, 1]} : vector<16x96xf32> to vector<16x8xf32>
    %29 = vector.extract_strided_slice %5 {offsets = [0, 72], sizes = [16, 8], strides = [1, 1]} : vector<16x96xf32> to vector<16x8xf32>
    %30 = arith.truncf %27 : vector<16x8xf32> to vector<16x8xbf16>
    %31 = arith.truncf %28 : vector<16x8xf32> to vector<16x8xbf16>
    %cst_9 = arith.constant dense<0.000000e+00> : vector<16x16xf32>
    %32 = tpu.matmul %30, %31, %cst_9 {dimension_numbers = #tpu.dot_dimension_numbers<[1], [1], [0], [0], [0, 0, 1, 0], [], []>} : vector<16x8xbf16>, vector<16x8xbf16>, vector<16x16xf32> -> vector<16x16xf32>
    %cst_10 = arith.constant 0.353553385 : f32
    %33 = vector.broadcast %cst_10 : f32 to vector<16x16xf32>
    %34 = arith.mulf %32, %33 : vector<16x16xf32>
    %cst_11 = arith.constant dense<0xFF800000> : vector<16xf32>
    %35 = vector.multi_reduction <maximumf>, %34, %cst_11 [1] : vector<16x16xf32> to vector<16xf32>
    %36 = vector.shape_cast %35 : vector<16xf32> to vector<16x1xf32>
    %37 = vector.broadcast %36 : vector<16x1xf32> to vector<16x16xf32>
    %38 = arith.subf %34, %37 : vector<16x16xf32>
    %39 = math.exp %38 : vector<16x16xf32>
    %cst_12 = arith.constant dense<0.000000e+00> : vector<16xf32>
    %40 = vector.multi_reduction <add>, %39, %cst_12 [1] : vector<16x16xf32> to vector<16xf32>
    %41 = vector.shape_cast %40 : vector<16xf32> to vector<16x1xf32>
    %42 = tpu.reciprocal %41 {approx = true} : vector<16x1xf32> -> vector<16x1xf32>
    %43 = vector.broadcast %42 : vector<16x1xf32> to vector<16x16xf32>
    %44 = arith.mulf %39, %43 : vector<16x16xf32>
    %45 = arith.truncf %44 : vector<16x16xf32> to vector<16x16xbf16>
    %46 = arith.truncf %29 : vector<16x8xf32> to vector<16x8xbf16>
    %cst_13 = arith.constant dense<0.000000e+00> : vector<16x8xf32>
    %47 = tpu.matmul %45, %46, %cst_13 {dimension_numbers = #tpu.dot_dimension_numbers<[1], [0], [0], [1], [0, 0, 1, 1], [], []>} : vector<16x16xbf16>, vector<16x8xbf16>, vector<16x8xf32> -> vector<16x8xf32>
    %48 = vector.extract_strided_slice %5 {offsets = [0, 16], sizes = [16, 8], strides = [1, 1]} : vector<16x96xf32> to vector<16x8xf32>
    %49 = vector.extract_strided_slice %5 {offsets = [0, 48], sizes = [16, 8], strides = [1, 1]} : vector<16x96xf32> to vector<16x8xf32>
    %50 = vector.extract_strided_slice %5 {offsets = [0, 80], sizes = [16, 8], strides = [1, 1]} : vector<16x96xf32> to vector<16x8xf32>
    %51 = arith.truncf %48 : vector<16x8xf32> to vector<16x8xbf16>
    %52 = arith.truncf %49 : vector<16x8xf32> to vector<16x8xbf16>
    %cst_14 = arith.constant dense<0.000000e+00> : vector<16x16xf32>
    %53 = tpu.matmul %51, %52, %cst_14 {dimension_numbers = #tpu.dot_dimension_numbers<[1], [1], [0], [0], [0, 0, 1, 0], [], []>} : vector<16x8xbf16>, vector<16x8xbf16>, vector<16x16xf32> -> vector<16x16xf32>
    %cst_15 = arith.constant 0.353553385 : f32
    %54 = vector.broadcast %cst_15 : f32 to vector<16x16xf32>
    %55 = arith.mulf %53, %54 : vector<16x16xf32>
    %cst_16 = arith.constant dense<0xFF800000> : vector<16xf32>
    %56 = vector.multi_reduction <maximumf>, %55, %cst_16 [1] : vector<16x16xf32> to vector<16xf32>
    %57 = vector.shape_cast %56 : vector<16xf32> to vector<16x1xf32>
    %58 = vector.broadcast %57 : vector<16x1xf32> to vector<16x16xf32>
    %59 = arith.subf %55, %58 : vector<16x16xf32>
    %60 = math.exp %59 : vector<16x16xf32>
    %cst_17 = arith.constant dense<0.000000e+00> : vector<16xf32>
    %61 = vector.multi_reduction <add>, %60, %cst_17 [1] : vector<16x16xf32> to vector<16xf32>
    %62 = vector.shape_cast %61 : vector<16xf32> to vector<16x1xf32>
    %63 = tpu.reciprocal %62 {approx = true} : vector<16x1xf32> -> vector<16x1xf32>
    %64 = vector.broadcast %63 : vector<16x1xf32> to vector<16x16xf32>
    %65 = arith.mulf %60, %64 : vector<16x16xf32>
    %66 = arith.truncf %65 : vector<16x16xf32> to vector<16x16xbf16>
    %67 = arith.truncf %50 : vector<16x8xf32> to vector<16x8xbf16>
    %cst_18 = arith.constant dense<0.000000e+00> : vector<16x8xf32>
    %68 = tpu.matmul %66, %67, %cst_18 {dimension_numbers = #tpu.dot_dimension_numbers<[1], [0], [0], [1], [0, 0, 1, 1], [], []>} : vector<16x16xbf16>, vector<16x8xbf16>, vector<16x8xf32> -> vector<16x8xf32>
    %69 = vector.extract_strided_slice %5 {offsets = [0, 24], sizes = [16, 8], strides = [1, 1]} : vector<16x96xf32> to vector<16x8xf32>
    %70 = vector.extract_strided_slice %5 {offsets = [0, 56], sizes = [16, 8], strides = [1, 1]} : vector<16x96xf32> to vector<16x8xf32>
    %71 = vector.extract_strided_slice %5 {offsets = [0, 88], sizes = [16, 8], strides = [1, 1]} : vector<16x96xf32> to vector<16x8xf32>
    %72 = arith.truncf %69 : vector<16x8xf32> to vector<16x8xbf16>
    %73 = arith.truncf %70 : vector<16x8xf32> to vector<16x8xbf16>
    %cst_19 = arith.constant dense<0.000000e+00> : vector<16x16xf32>
    %74 = tpu.matmul %72, %73, %cst_19 {dimension_numbers = #tpu.dot_dimension_numbers<[1], [1], [0], [0], [0, 0, 1, 0], [], []>} : vector<16x8xbf16>, vector<16x8xbf16>, vector<16x16xf32> -> vector<16x16xf32>
    %cst_20 = arith.constant 0.353553385 : f32
    %75 = vector.broadcast %cst_20 : f32 to vector<16x16xf32>
    %76 = arith.mulf %74, %75 : vector<16x16xf32>
    %cst_21 = arith.constant dense<0xFF800000> : vector<16xf32>
    %77 = vector.multi_reduction <maximumf>, %76, %cst_21 [1] : vector<16x16xf32> to vector<16xf32>
    %78 = vector.shape_cast %77 : vector<16xf32> to vector<16x1xf32>
    %79 = vector.broadcast %78 : vector<16x1xf32> to vector<16x16xf32>
    %80 = arith.subf %76, %79 : vector<16x16xf32>
    %81 = math.exp %80 : vector<16x16xf32>
    %cst_22 = arith.constant dense<0.000000e+00> : vector<16xf32>
    %82 = vector.multi_reduction <add>, %81, %cst_22 [1] : vector<16x16xf32> to vector<16xf32>
    %83 = vector.shape_cast %82 : vector<16xf32> to vector<16x1xf32>
    %84 = tpu.reciprocal %83 {approx = true} : vector<16x1xf32> -> vector<16x1xf32>
    %85 = vector.broadcast %84 : vector<16x1xf32> to vector<16x16xf32>
    %86 = arith.mulf %81, %85 : vector<16x16xf32>
    %87 = arith.truncf %86 : vector<16x16xf32> to vector<16x16xbf16>
    %88 = arith.truncf %71 : vector<16x8xf32> to vector<16x8xbf16>
    %cst_23 = arith.constant dense<0.000000e+00> : vector<16x8xf32>
    %89 = tpu.matmul %87, %88, %cst_23 {dimension_numbers = #tpu.dot_dimension_numbers<[1], [0], [0], [1], [0, 0, 1, 1], [], []>} : vector<16x16xbf16>, vector<16x8xbf16>, vector<16x8xf32> -> vector<16x8xf32>
    %90 = tpu.concatenate %26, %47, %68, %89 in 1 : vector<16x8xf32>, vector<16x8xf32>, vector<16x8xf32>, vector<16x8xf32> -> vector<16x32xf32>
    %c0_24 = arith.constant 0 : index
    %c0_25 = arith.constant 0 : index
    %91 = vector.load %arg5[%c0_24, %c0_25] : memref<1x32xf32, #tpu.memory_space<vmem>>, vector<1x32xf32>
    %92 = vector.broadcast %91 : vector<1x32xf32> to vector<16x32xf32>
    %93 = arith.mulf %90, %92 : vector<16x32xf32>
    %94 = arith.truncf %93 : vector<16x32xf32> to vector<16x32xbf16>
    %c0_26 = arith.constant 0 : index
    %c0_27 = arith.constant 0 : index
    %95 = vector.load %arg3[%c0_26, %c0_27] : memref<32x32xf32, #tpu.memory_space<vmem>>, vector<32x32xf32>
    %96 = arith.truncf %95 : vector<32x32xf32> to vector<32x32xbf16>
    %cst_28 = arith.constant dense<0.000000e+00> : vector<16x32xf32>
    %97 = tpu.matmul %94, %96, %cst_28 {dimension_numbers = #tpu.dot_dimension_numbers<[1], [0], [0], [1], [0, 0, 1, 1], [], []>} : vector<16x32xbf16>, vector<32x32xbf16>, vector<16x32xf32> -> vector<16x32xf32>
    %c0_29 = arith.constant 0 : index
    %c0_30 = arith.constant 0 : index
    %98 = vector.load %arg4[%c0_29, %c0_30] : memref<1x32xf32, #tpu.memory_space<vmem>>, vector<1x32xf32>
    %99 = vector.broadcast %98 : vector<1x32xf32> to vector<16x32xf32>
    %100 = arith.addf %97, %99 : vector<16x32xf32>
    %c0_31 = arith.constant 0 : index
    %c0_32 = arith.constant 0 : index
    %c0_33 = arith.constant 0 : index
    %101 = vector.load %arg6[%c0_31, %c0_32, %c0_33] : memref<1x16x32xf32, #tpu.memory_space<vmem>>, vector<1x16x32xf32>
    %102 = vector.shape_cast %101 : vector<1x16x32xf32> to vector<16x32xf32>
    %103 = vector.shape_cast %100 : vector<16x32xf32> to vector<1x16x32xf32>
    tpu.vector_store %arg6[%c0_31, %c0_32, %c0_33], %103 {strides = array<i32>} : memref<1x16x32xf32, #tpu.memory_space<vmem>>, vector<1x16x32xf32>,
    return
  }
  func.func @transform_0(%arg0: i32) -> (i32, i32, i32) {
    %c0_i32 = arith.constant 0 : i32
    %c0_i32_0 = arith.constant 0 : i32
    %c0_i32_1 = arith.constant 0 : i32
    return %arg0, %c0_i32, %c0_i32_0 : i32, i32, i32
  }
  func.func @transform_1(%arg0: i32) -> (i32, i32) {
    %c0_i32 = arith.constant 0 : i32
    %c0_i32_0 = arith.constant 0 : i32
    %c0_i32_1 = arith.constant 0 : i32
    return %c0_i32, %c0_i32_0 : i32, i32
  }
  func.func @transform_2(%arg0: i32) -> (i32, i32) {
    %c0_i32 = arith.constant 0 : i32
    %c0_i32_0 = arith.constant 0 : i32
    %c0_i32_1 = arith.constant 0 : i32
    return %c0_i32, %c0_i32_0 : i32, i32
  }
  func.func @transform_3(%arg0: i32) -> (i32, i32) {
    %c0_i32 = arith.constant 0 : i32
    %c0_i32_0 = arith.constant 0 : i32
    %c0_i32_1 = arith.constant 0 : i32
    return %c0_i32, %c0_i32_0 : i32, i32
  }
  func.func @transform_4(%arg0: i32) -> (i32, i32) {
    %c0_i32 = arith.constant 0 : i32
    %c0_i32_0 = arith.constant 0 : i32
    %c0_i32_1 = arith.constant 0 : i32
    return %c0_i32, %c0_i32_0 : i32, i32
  }
  func.func @transform_5(%arg0: i32) -> (i32, i32, i32) {
    %c0_i32 = arith.constant 0 : i32
    %c0_i32_0 = arith.constant 0 : i32
    %c0_i32_1 = arith.constant 0 : i32
    return %arg0, %c0_i32, %c0_i32_0 : i32, i32, i32
  }
}

</mosaic_0001>

<bundles_post_ra>
// kernel: tpu_custom_call.1
= control target key start
LH: loop header
LB: loop body
LE: loop exit
PB: predicated region body
PF: predicated region fallthrough
CT: control target
= control target key end

     0   :  { %10 = vsyncpa [#allocation3], 0  ;;  %s1766_s0 = inlined_call_operand.hbm [shape: f32[2,16,32], index: 0, kind: input, shape index: {}]   ;;  %s1767_s1 = inlined_call_operand.hbm [shape: f32[32,96], index: 1, kind: input, shape index: {}]   ;;  %s1768_s2 = inlined_call_operand.hbm [shape: f32[32,32], index: 2, kind: input, shape index: {}]   ;;  %s1769_s3 = inlined_call_operand.vmem [shape: f32[1,32], index: 3, kind: input, shape index: {}]   ;;  %s1770_s4 = inlined_call_operand.vmem [shape: f32[1,32], index: 4, kind: input, shape index: {}]   ;;  %s1771_s5 = inlined_call_operand.hbm [shape: f32[2,16,32], index: 5, kind: output, shape index: {}]  }
   0x1   :  { %12 = vsyncpa [#allocation3 + $0x1], 0 }
   0x2   :  { %13 = vsyncpa [#allocation6], 0 }
   0x3   :  { %14 = vsyncpa [#allocation4], 0 }
   0x4   :  { %16 = vsyncpa [#allocation4 + $0x1], 0  ;;  %s1466_s18 = smov 0   ;;  %s1468_s19 = smov 0  }
   0x5   :  { %s1470_s20 = smov 0   ;;  %s1472_s21 = smov 0  }
   0x6 LB: > { %s1487_s22 = sadd.s32 4294967295, %s1411_s21   ;;  %s1027_s23 = sadd.s32 4294967294, %s1411_s21   ;;  %s1411_s21 = sphi %s1472_s21, %s1794_s21   ;;  %s1407_s20 = sphi %s1470_s20, %s1793_s20   ;;  %s1403_s19 = sphi %s1468_s19, %s1792_s19   ;;  %s1399_s18 = sphi %s1466_s18, %s1791_s18  }
   0x7   : > { %p42_p0 = scmp.ne.s32.totalorder %s1403_s19, %s1399_s18  ;;  %p1772_p1 = scmp.eq.s32.totalorder %s1487_s22, 0 }
   0x8   : > { %p150_p2 = scmp.eq.s32.totalorder %s1487_s22, 1  ;;  %p156_p3 = scmp.eq.s32.totalorder %s1027_s23, 1 }
   0x9   : > { %p1496_p4 = por %p1772_p1, %p42_p0  ;;  %p1028_p5 = scmp.ge.s32.totalorder %s1411_s21, 1 }
   0xa   : > { %p1501_p6 = por %p156_p3, %p42_p0  ;;  %p163_p7 = scmp.lt.s32.totalorder %s1411_s21, 3 }
   0xb   : > { %s1777_s24 = scalar_select %p1496_p4, 1, 0 }
   0xc   : > { %s1778_s25 = scalar_select %p1501_p6, 1, 0 }
   0xd   : > { %p1506_p8 = pnand %p1028_p5, %p163_p7  ;;  %s1413_s27 = smov [#allocation5]  }
   0xe   : > { %s175_s28 = sshll.u32 %s1413_s27, 4  ;;  %s1414_s30 = smov [#allocation7]   ;;  %s176_s28 = int_to_ptr.vmem [resolvable:$true] %s175_s28 }
   0xf   : > { %s1779_s26 = scalar_select %p1506_p8, 1, 0 }
  0x10   : > { %p1157_p9 = pneg %p1506_p8  ;;  %s188_s6 = sshll.u32 %s1414_s30, 4  ;;  %s189_s6 = int_to_ptr.vmem [resolvable:$true] %s188_s6 }
  0x11   : > { %s1274_s7 = scalar_lea.vmem %s176_s28, 512  ;;  %p1282_p5 = scmp.lt.s32.totalorder %s176_s28, %s176_s28 }
  0x12   : > { %p1515_p11 = pnand %p1157_p9, %p1772_p1  ;;  %p1275_p13 = scmp.ne.s32.totalorder %s176_s28, %s1274_s7 }
  0x13   : > { %p1283_p7 = scmp.lt.s32.totalorder %s1274_s7, %s1274_s7 }
  0x14   : > { %p1265_p12 = pneg %p1515_p11 }
  0x15   : > { %p1284_p10 = por %p1283_p7, %p1282_p5 }
  0x16   : > { %p1277_p0 = pnand %p1275_p13, %p1265_p12 }
  0x18   : > { %p1278_p3 = pneg %p1277_p0 }
  0x1a   : > { %p1285_p9 = pnand %p1284_p10, %p1278_p3 }
  0x1c   : > { %1288 = shalt.err (!%p1285_p9)
}
  0x1d   : > { %s1773_s8 = smov 128   ;;  %s1416_s9 = smov 8  }
  0x1e   : > { %1160 = dma.hbm_to_vmem [thread:$0]  (!%p1515_p11), %s1767_s1, 512, %s176_s28, [#allocation6], %s1773_s8, %s1773_s8, %s1416_s9  }
  0x1f   : > { %s1300_s12 = scalar_lea.vmem %s189_s6, 512  ;;  %p1308_p10 = scmp.lt.s32.totalorder %s189_s6, %s189_s6 }
  0x20   : > { %p1301_p13 = scmp.ne.s32.totalorder %s189_s6, %s1300_s12  ;;  %p1309_p3 = scmp.lt.s32.totalorder %s1300_s12, %s1300_s12 }
  0x22   : > { %p1303_p0 = pnand %p1301_p13, %p1265_p12  ;;  %p1310_p7 = por %p1309_p3, %p1308_p10 }
  0x24   : > { %p1304_p5 = pneg %p1303_p0 }
  0x26   : > { %p1311_p9 = pnand %p1310_p7, %p1304_p5 }
  0x28   : > { %1314 = shalt.err (!%p1311_p9)
}
  0x29   : > { %1163 = dma.hbm_to_vmem [thread:$0]  (!%p1515_p11), %s1768_s2, 512, %s189_s6, [#allocation6], %s1773_s8, %s1773_s8, %s1416_s9  }
  0x2a   : > { %s1544_s15 = sadd.s32 1, %s1411_s21   ;;  %s29_s16 = sadd.s32 1, %s1407_s20 }
  0x2b   : > { %s26_s17 = ssub.s32 %s1411_s21, %s1544_s15  ;;  %p36_p12 = scmp.ne.s32.totalorder %s1407_s20, %s1403_s19 }
  0x2c   : > { %p27_p13 = scmp.eq.s32.totalorder %s26_s17, 0  ;;  %p37_p0 = scmp.eq.s32.totalorder %s1411_s21, 0 }
  0x2d   : > { %p1554_p5 = por %p150_p2, %p36_p12  ;;  %p1174_p10 = scmp.lt.s32.totalorder %s1411_s21, 2 }
  0x2e   : > { %s1560_s27 = scalar_select %p27_p13, %s1407_s20, %s29_s16  }
  0x2f   : > { %s1781_s23 = scalar_select %p1554_p5, 1, 0 }
  0x30   : > { %p38_p3 = por %p37_p0, %p36_p12  ;;  %s208_s28 = sand.u32 1, %s1407_s20  }
  0x31   : > { %s1032_s29 = sshll.u32 %s208_s28, 4  ;;  %s1057_s30 = sshll.u32 %s1411_s21, 8 }
  0x32   : > { %s1567_s10 = scalar_lea.hbm %s1766_s0, %s1057_s30  ;;  %s212_s11 = scalar_lea.vmem [#allocation2], %s1032_s29 }
  0x33   : > { %s219_s12 = sshll.u32 %s212_s11, 4  ;;  %p1571_p2 = pnand %p1174_p10, %p38_p3  ;;  %s1569_s12 = int_to_ptr.vmem [resolvable:$true] %s219_s12 }
  0x34   : > { %s1575_s14 = scalar_lea.sflag [#allocation3], %s208_s28  ;;  %s1315_s16 = scalar_lea.hbm %s1567_s10, 256 }
  0x35   : > { %p1316_p11 = scmp.ne.s32.totalorder %s1567_s10, %s1315_s16  ;;  %p1317_p7 = pneg %p1571_p2 }
  0x36   : > { %s1320_s29 = scalar_lea.hbm %s1766_s0, 512  ;;  %p1321_p13 = scmp.lt.s32.totalorder %s1567_s10, %s1766_s0 }
  0x37   : > { %p1318_p9 = pnand %p1317_p7, %p1316_p11  ;;  %p1322_p0 = scmp.lt.s32.totalorder %s1320_s29, %s1315_s16 }
  0x39   : > { %p1319_p12 = pneg %p1318_p9  ;;  %p1323_p10 = por %p1322_p0, %p1321_p13 }
  0x3b   : > { %p1324_p3 = pnand %p1323_p10, %p1319_p12 }
  0x3d   : > { %1327 = shalt.err (!%p1324_p3)
}
  0x3e   : > { %s1328_s28 = scalar_lea.vmem %s1569_s12, 256  ;;  %s1417_s11 = smov [#allocation2]  }
  0x3f   : > { %p1329_p1 = scmp.ne.s32.totalorder %s1569_s12, %s1328_s28  ;;  %s1333_s8 = sshll.u32 %s1417_s11, 4  ;;  %s1334_s8 = int_to_ptr.vmem [resolvable:$false] %s1333_s8 }
  0x40   : > { %s1335_s17 = scalar_lea.vmem %s1334_s8, 512  ;;  %p1336_p9 = scmp.lt.s32.totalorder %s1569_s12, %s1334_s8 }
  0x41   : > { %p1331_p6 = pnand %p1329_p1, %p1317_p7  ;;  %p1337_p5 = scmp.lt.s32.totalorder %s1335_s17, %s1328_s28 }
  0x43   : > { %p1332_p11 = pneg %p1331_p6  ;;  %p1338_p4 = por %p1337_p5, %p1336_p9 }
  0x45   : > { %p1339_p8 = pnand %p1338_p4, %p1332_p11 }
  0x47   : > { %1342 = shalt.err (!%p1339_p8)
}
  0x48   : > { %s1783_s16 = smov 128   ;;  %p1784_p1 = scmp.ne.s32.totalorder %s1779_s26, 0 }
  0x49   : > { %1167 = dma.hbm_to_vmem [thread:$0]  (!%p1571_p2), %s1567_s10, 256, %s1569_s12, %s1575_s14, %s1783_s16, %s1783_s16, %s1416_s9  }
  0x4a   : > { %231 = sbr.rel (%p1784_p1) target bundleno = 1527 (0x5f7), region = 40  ;;  %s1602_s30 = sand.u32 (!%p1784_p1), 1, %s1403_s19  }
  0x4b   : > { %s1036_s8 = sshll.u32 (!%p1784_p1), %s1602_s30, 4  ;;  %s234_s29 = scalar_lea.sflag (!%p1784_p1), [#allocation3], %s1602_s30 }
  0x4c   : > { %s237_s13 = scalar_lea.vmem (!%p1784_p1), [#allocation2], %s1036_s8  ;;  %p1785_p4 = scmp.ne.s32.totalorder (!%p1784_p1), %s1777_s24, 0 }
  0x4f   : > { %1386 = dma.done.wait (%p1785_p4), %s234_s29, 256  }
  0x50   : > { %1388 = vsyncadd (%p1785_p4), %s234_s29, 4294967040  ;;  %p1786_p6 = scmp.eq.s32.totalorder %s1487_s22, 0 }
  0x52   : > { %1390 = dma.done.wait (%p1786_p6), [#allocation6], 1024   ;;  %p1787_p8 = pmov %p1786_p6 }
  0x53   : > { %v1418_v0 = vmov 0.0   ;;  %vm1419_vm0 = vmmov 0   ;;  %v278_v1 = vld [vmem:[#allocation5 + $0x10] sm:$0xff]  ;;  %v279_v2 = vld [vmem:[#allocation5 + $0x18] sm:$0xff]  ;;  %v276_v3 = vld [vmem:[#allocation5] sm:$0xff]  ;;  %vm282_vm1 = vcmask 261120  }
  0x54   : > { %1392 = vsyncadd (%p1787_p8), [#allocation6], 4294966272  ;;  %1081 = vmatprep.subr.bf16.mxu0 %v1418_v0  ;;  %1085 = vmatprep.mubr.msk.bf16.mxu0 %vm1419_vm0, %v1418_v0  ;;  %v281_v4 = vpack.c.bf16 %v279_v2, %v278_v1  ;;  %v277_v5 = vld [vmem:[#allocation5 + $0x8] sm:$0xff]  ;;  %v273_v7 = vld [vmem:[%s237_s13] sm:$0xff]  ;;  %s1420_s24 = smov 120   ;;  %s1421_s26 = smov 96  }
  0x55   : > { %1089 = vmatprep.subr.bf16.mxu1 %v1418_v0  ;;  %1091 = vmatprep.mubr.msk.bf16.mxu1 %vm1419_vm0, %v1418_v0  ;;  %v280_v6 = vpack.c.bf16 %v277_v5, %v276_v3  ;;  %v274_v8 = vld [vmem:[%s237_s13 + $0x8] sm:$0xff]  ;;  %s1422_s9 = smov 80   ;;  %s1423_s10 = smov 88   ;;  %vm331_vm2 = vcmask 64512   ;;  %vm381_vm3 = vcmask 130048   ;;  %vm849_vm4 = vcmask 195584  }
  0x56   : > { %1082 = vmatpush3.bf16.msra.mxu0 %v281_v4  ;;  %v275_v9 = vpack.c.bf16 %v274_v8, %v273_v7  ;;  %s1424_s12 = smov 72   ;;  %s1425_s14 = smov 112  }
  0x57   : > { %1083 = vmatprep.subr.bf16.mxu0 %v1418_v0  ;;  %s1426_s6 = smov 104   ;;  %s1427_s7 = smov 56  }
  0x58   : > { %s1428_s28 = smov 64   ;;  %s1429_s11 = smov 48  }
  0x59   : > { %s1430_s17 = smov 40   ;;  %s1431_s16 = smov 8  }
  0x5a   : > { %1084 = vmatpush3.bf16.msra.mxu0 %v280_v6  ;;  %s1432_s29 = smov 16   ;;  %s1433_s13 = smov 24  }
  0x5b   : > { %1095 = vmatprep.subr.bf16.mxu0 %v1418_v0  ;;  %p1788_p2 = scmp.ne.s32.totalorder %s1781_s23, 0 }
  0x5d   : > { %1086 = vmatmul.mubr.msk.bf16.vlgmr.msra.gmra.mxu0 %vm282_vm1, %v275_v9 }
  0x5e   : > { %1097 = vmatprep.mubr.msk.bf16.mxu0 %vm1419_vm0, %v1418_v0 }
 0x11d   : > { %v320_v10 = vpop.f32.mrf.mxu0 }
 0x11f   : > { %v1087_v11 = vpop.f32.mrf.mxu0 }
 0x121   : > { %v323_v12 = vpop.f32.mrf.mxu0 }
 0x122   : > { %v1627_v13 = vpack.c.bf16 %v323_v12, %v320_v10 }
 0x123   : > { %v1088_v14 = vpop.f32.mrf.mxu0 }
 0x124   : > { %452 = vrot.lane.b32.xlu1 %v1627_v13, %s1420_s24  ;;  %329 = vrot.lane.b32.xlu0 %v1627_v13, %s1421_s26 }
 0x128   : > { %577 = vrot.lane.b32.xlu1 %v1627_v13, %s1422_s9  ;;  %454 = vrot.lane.b32.xlu0 %v1627_v13, %s1423_s10 }
 0x12c   : > { %700 = vrot.lane.b32.xlu1 %v1627_v13, %s1424_s12  ;;  %575 = vrot.lane.b32.xlu0 %v1627_v13, %s1425_s14  ;;  %s271_s12 = scalar_lea.vmem [#allocation8], %s1036_s8  ;;  %s922_s8 = scalar_lea.sflag [#allocation4], %s1602_s30 }
 0x12d   : > { %s935_s14 = sshll.u32 %s271_s12, 4  ;;  %s1716_s14 = int_to_ptr.vmem [resolvable:$true] %s935_s14 }
 0x130   : > { %698 = vrot.lane.b32.xlu0 %v1627_v13, %s1426_s6  ;;  %s1058_s6 = sshll.u32 %s1487_s22, 8  ;;  %s1434_s22 = smov [#allocation8]  }
 0x196   : > { %v330_v15 = vpop.permute.xlu0 %329  ;;  %v453_v18 = vpop.permute.xlu1 %452 }
 0x197   : > { %v336_v16 = vsel %vm331_vm2, %v330_v15, 0 }
 0x198   : > { %1090 = vmatpush3.bf16.xpose.msra.mxu1 %v336_v16 }
 0x199   : > { %1101 = vmatprep.subr.bf16.mxu1 %v1418_v0 }
 0x19a   : > { %v455_v17 = vpop.permute.xlu0 %454  ;;  %v578_v20 = vpop.permute.xlu1 %577 }
 0x19b   : > { %v460_v19 = vsel %vm331_vm2, %v455_v17, 0  ;;  %v583_v21 = vsel %vm331_vm2, %v578_v20, 0 }
 0x19e   : > { %v701_v22 = vpop.permute.xlu1 %700  ;;  %v576_v23 = vpop.permute.xlu0 %575 }
 0x19f   : > { %1092 = vmatmul.mubr.msk.bf16.vlgmr.msra.gmra.mxu1 %vm331_vm2, %v1627_v13  ;;  %v706_v24 = vsel %vm331_vm2, %v701_v22, 0 }
 0x1a0   : > { %1102 = vmatpush3.bf16.xpose.msra.mxu1 %v460_v19  ;;  %1103 = vmatprep.mubr.msk.bf16.mxu1 %vm1419_vm0, %v1418_v0 }
 0x1a1   : > { %1113 = vmatprep.subr.bf16.mxu1 %v1418_v0 }
 0x1a2   : > { %v699_v25 = vpop.permute.xlu0 %698 }
 0x1a7   : > { %1104 = vmatmul.mubr.msk.bf16.vlgmr.msra.gmra.mxu1 %vm331_vm2, %v453_v18 }
 0x1a8   : > { %1114 = vmatpush3.bf16.xpose.msra.mxu1 %v583_v21  ;;  %1115 = vmatprep.mubr.msk.bf16.mxu1 %vm1419_vm0, %v1418_v0 }
 0x1a9   : > { %1125 = vmatprep.subr.bf16.mxu1 %v1418_v0 }
 0x1af   : > { %1116 = vmatmul.mubr.msk.bf16.vlgmr.msra.gmra.mxu1 %vm331_vm2, %v576_v23 }
 0x1b0   : > { %1126 = vmatpush3.bf16.xpose.msra.mxu1 %v706_v24  ;;  %1127 = vmatprep.mubr.msk.bf16.mxu1 %vm1419_vm0, %v1418_v0 }
 0x1b1   : > { %1137 = vmatprep.subr.bf16.mxu1 %v1418_v0 }
 0x1b7   : > { %1128 = vmatmul.mubr.msk.bf16.vlgmr.msra.gmra.mxu1 %vm331_vm2, %v699_v25 }
 0x1b8   : > { %1141 = vmatprep.mubr.msk.bf16.mxu1 %vm1419_vm0, %v1418_v0 }
 0x25f   : > { %v372_v26 = vpop.f32.mrf.mxu1 }
 0x260   : > { %v379_v27 = vmul.f32 0.35355338, %v372_v26 }
 0x261   : > { %v1093_v28 = vpop.f32.mrf.mxu1 }
 0x262   : > { %v382_v29 = vsel %vm381_vm3, %v379_v27, -inf }
 0x263   : > { %383 = vmax.xlane.f32.xlu1 %v382_v29  ;;  %v375_v30 = vpop.f32.mrf.mxu1 }
 0x264   : > { %v380_v31 = vmul.f32 0.35355338, %v375_v30 }
 0x265   : > { %v1094_v32 = vpop.f32.mrf.mxu1 }
 0x266   : > { %v385_v33 = vsel %vm381_vm3, %v380_v31, -inf }
 0x267   : > { %386 = vmax.xlane.f32.xlu0 %v385_v33  ;;  %v496_v34 = vpop.f32.mrf.mxu1 }
 0x268   : > { %v503_v35 = vmul.f32 0.35355338, %v496_v34 }
 0x269   : > { %v1105_v36 = vpop.f32.mrf.mxu1 }
 0x26a   : > { %v505_v37 = vsel %vm381_vm3, %v503_v35, -inf }
 0x26b   : > { %506 = vmax.xlane.f32.xlu0 %v505_v37  ;;  %v499_v38 = vpop.f32.mrf.mxu1 }
 0x26c   : > { %v504_v39 = vmul.f32 0.35355338, %v499_v38 }
 0x26d   : > { %v1106_v40 = vpop.f32.mrf.mxu1 }
 0x26e   : > { %v508_v41 = vsel %vm381_vm3, %v504_v39, -inf }
 0x26f   : > { %509 = vmax.xlane.f32.xlu1 %v508_v41  ;;  %v619_v42 = vpop.f32.mrf.mxu1 }
 0x270   : > { %v626_v43 = vmul.f32 0.35355338, %v619_v42 }
 0x271   : > { %v1117_v44 = vpop.f32.mrf.mxu1 }
 0x272   : > { %v628_v45 = vsel %vm381_vm3, %v626_v43, -inf }
 0x273   : > { %629 = vmax.xlane.f32.xlu0 %v628_v45  ;;  %v622_v46 = vpop.f32.mrf.mxu1 }
 0x274   : > { %v627_v47 = vmul.f32 0.35355338, %v622_v46 }
 0x275   : > { %v1118_v48 = vpop.f32.mrf.mxu1 }
 0x276   : > { %v631_v49 = vsel %vm381_vm3, %v627_v47, -inf }
 0x277   : > { %632 = vmax.xlane.f32.xlu1 %v631_v49  ;;  %v742_v50 = vpop.f32.mrf.mxu1 }
 0x278   : > { %v749_v51 = vmul.f32 0.35355338, %v742_v50 }
 0x279   : > { %v1129_v52 = vpop.f32.mrf.mxu1 }
 0x27a   : > { %v751_v53 = vsel %vm381_vm3, %v749_v51, -inf }
 0x27b   : > { %752 = vmax.xlane.f32.xlu0 %v751_v53  ;;  %v745_v54 = vpop.f32.mrf.mxu1 }
 0x27c   : > { %v750_v55 = vmul.f32 0.35355338, %v745_v54 }
 0x27d   : > { %v1130_v56 = vpop.f32.mrf.mxu1 }
 0x27e   : > { %v754_v57 = vsel %vm381_vm3, %v750_v55, -inf }
 0x27f   : > { %755 = vmax.xlane.f32.xlu1 %v754_v57 }
 0x2ec   : > { %v384_v58 = vpop.xlane.xlu1 %383 }
 0x2ed   : > { %v388_v59 = vsub.f32 %v379_v27, %v384_v58 }
 0x2ef   : > { %v390_v60 = vmul.f32 1.442695, %v388_v59 }
 0x2f0   : > { %v387_v61 = vpop.xlane.xlu0 %386 }
 0x2f1   : > { %1231 = vpow2.f32 %v390_v60  ;;  %v389_v62 = vsub.f32 %v380_v31, %v387_v61 }
 0x2f3   : > { %v392_v63 = vmul.f32 1.442695, %v389_v62 }
 0x2f4   : > { %v507_v1 = vpop.xlane.xlu0 %506 }
 0x2f5   : > { %1233 = vpow2.f32 %v392_v63  ;;  %v511_v2 = vsub.f32 %v503_v35, %v507_v1 }
 0x2f7   : > { %v513_v3 = vmul.f32 1.442695, %v511_v2 }
 0x2f8   : > { %v510_v10 = vpop.xlane.xlu1 %509 }
 0x2f9   : > { %1235 = vpow2.f32 %v513_v3  ;;  %v512_v11 = vsub.f32 %v504_v39, %v510_v10 }
 0x2fb   : > { %v515_v16 = vmul.f32 1.442695, %v512_v11  ;;  %v864_v11 = vld [vmem:[#allocation7 + $0x10] sm:$0xff] }
 0x2fc   : > { %v630_v12 = vpop.xlane.xlu0 %629 }
 0x2fd   : > { %v634_v15 = vsub.f32 %v626_v43, %v630_v12  ;;  %1237 = vpow2.f32 %v515_v16  ;;  %v865_v12 = vld [vmem:[#allocation7 + $0x18] sm:$0xff] }
 0x2fe   : > { %v1232_v4 = vpop.eup %1231 }
 0x2ff   : > { %v394_v5 = vsel %vm381_vm3, %v1232_v4, 0.0  ;;  %v636_v20 = vmul.f32 1.442695, %v634_v15 }
 0x300   : > { %395 = vadd.xlane.f32.xlu0 %v394_v5  ;;  %v633_v14 = vpop.xlane.xlu1 %632 }
 0x301   : > { %v635_v17 = vsub.f32 %v627_v47, %v633_v14  ;;  %1239 = vpow2.f32 %v636_v20  ;;  %v867_v14 = vpack.c.bf16 %v865_v12, %v864_v11 }
 0x302   : > { %v1234_v6 = vpop.eup %1233 }
 0x303   : > { %v397_v7 = vsel %vm381_vm3, %v1234_v6, 0.0  ;;  %v638_v22 = vmul.f32 1.442695, %v635_v17  ;;  %1138 = vmatpush3.bf16.msra.mxu1 %v867_v14  ;;  %v862_v17 = vld [vmem:[#allocation7] sm:$0xff] }
 0x304   : > { %398 = vadd.xlane.f32.xlu1 %v397_v7  ;;  %v753_v18 = vpop.xlane.xlu0 %752  ;;  %1139 = vmatprep.subr.bf16.mxu1 %v1418_v0 }
 0x305   : > { %v757_v21 = vsub.f32 %v749_v51, %v753_v18  ;;  %1241 = vpow2.f32 %v638_v22  ;;  %v863_v18 = vld [vmem:[#allocation7 + $0x8] sm:$0xff] }
 0x306   : > { %v1667_v8 = vpop.eup %1235 }
 0x307   : > { %v517_v9 = vsel %vm381_vm3, %v1667_v8, 0.0  ;;  %v759_v24 = vmul.f32 1.442695, %v757_v21 }
 0x308   : > { %518 = vadd.xlane.f32.xlu0 %v517_v9  ;;  %v756_v19 = vpop.xlane.xlu1 %755 }
 0x309   : > { %v758_v23 = vsub.f32 %v750_v55, %v756_v19  ;;  %1243 = vpow2.f32 %v759_v24  ;;  %v866_v19 = vpack.c.bf16 %v863_v18, %v862_v17 }
 0x30a   : > { %v1238_v26 = vpop.eup %1237 }
 0x30b   : > { %v761_v25 = vmul.f32 1.442695, %v758_v23  ;;  %v520_v28 = vsel %vm381_vm3, %v1238_v26, 0.0  ;;  %1140 = vmatpush3.bf16.msra.mxu1 %v866_v19 }
 0x30d   : > { %1245 = vpow2.f32 %v761_v25 }
 0x30e   : > { %v1240_v27 = vpop.eup %1239 }
 0x30f   : > { %v640_v32 = vsel %vm381_vm3, %v1240_v27, 0.0 }
 0x312   : > { %v1242_v29 = vpop.eup %1241 }
 0x313   : > { %v643_v31 = vsel %vm381_vm3, %v1242_v29, 0.0 }
 0x315   : > { %528 = vrot.lane.b32.xlu1 %v1627_v13, %s1427_s7 }
 0x316   : > { %v1674_v30 = vpop.eup %1243 }
 0x317   : > { %v763_v35 = vsel %vm381_vm3, %v1674_v30, 0.0 }
 0x31a   : > { %v1246_v33 = vpop.eup %1245 }
 0x31b   : > { %v766_v34 = vsel %vm381_vm3, %v1246_v33, 0.0 }
 0x31e   : > { %405 = vrot.lane.b32.xlu0 %v1627_v13, %s1428_s28 }
 0x339   : > { %521 = vadd.xlane.f32.xlu1 %v520_v28 }
 0x33d   : > { %644 = vadd.xlane.f32.xlu1 %v643_v31  ;;  %641 = vadd.xlane.f32.xlu0 %v640_v32 }
 0x341   : > { %767 = vadd.xlane.f32.xlu1 %v766_v34  ;;  %764 = vadd.xlane.f32.xlu0 %v763_v35  ;;  %v1049_v34 = vld [vmem:[%s1770_s4] ss:$0 sm:$0xff] }
 0x352   : > { %651 = vrot.lane.b32.xlu1 %v1627_v13, %s1429_s11  ;;  %s1721_s11 = scalar_lea.hbm %s1771_s5, %s1058_s6 }
 0x357   : > { %774 = vrot.lane.b32.xlu0 %v1627_v13, %s1430_s17  ;;  %s1343_s17 = scalar_lea.vmem %s1716_s14, 256 }
 0x358   : > { %p1344_p5 = scmp.ne.s32.totalorder %s1716_s14, %s1343_s17 }
 0x35a   : > { %p1345_p7 = pnand %p1344_p5, %p1788_p2 }
 0x35c   : > { %p1346_p12 = pneg %p1345_p7 }
 0x389   : > { %v396_v36 = vpop.xlane.xlu0 %395 }
 0x38a   : > { %1247 = vrcp.f32 %v396_v36 }
 0x38d   : > { %v399_v37 = vpop.xlane.xlu1 %398 }
 0x38e   : > { %1249 = vrcp.f32 %v399_v37 }
 0x391   : > { %v519_v38 = vpop.xlane.xlu0 %518  ;;  %v529_v45 = vpop.permute.xlu1 %528 }
 0x392   : > { %1251 = vrcp.f32 %v519_v38 }
 0x395   : > { %v406_v39 = vpop.permute.xlu0 %405 }
 0x396   : > { %1096 = vmatpush3.bf16.msra.mxu0 %v406_v39 }
 0x397   : > { %1107 = vmatprep.subr.bf16.mxu0 %v1418_v0  ;;  %v1248_v40 = vpop.eup %1247 }
 0x398   : > { %v402_v42 = vmul.f32 %v1248_v40, %v1232_v4 }
 0x39b   : > { %v1250_v41 = vpop.eup %1249 }
 0x39c   : > { %v403_v43 = vmul.f32 %v1250_v41, %v1234_v6 }
 0x39e   : > { %v404_v44 = vpack.c.bf16 %v403_v43, %v402_v42  ;;  %v1050_v42 = vld [vmem:[%s1769_s3] ss:$0 sm:$0xff] }
 0x39f   : > { %v1252_v50 = vpop.eup %1251 }
 0x3a0   : > { %1098 = vmatmul.mubr.msk.bf16.vlgmr.msra.gmra.mxu0 %vm381_vm3, %v404_v44  ;;  %v525_v52 = vmul.f32 %v1252_v50, %v1667_v8 }
 0x3a1   : > { %1108 = vmatpush3.bf16.msra.mxu0 %v529_v45  ;;  %1109 = vmatprep.mubr.msk.bf16.mxu0 %vm1419_vm0, %v1418_v0 }
 0x3a2   : > { %1119 = vmatprep.subr.bf16.mxu0 %v1418_v0 }
 0x3c2   : > { %v522_v13 = vpop.xlane.xlu1 %521 }
 0x3c3   : > { %1253 = vrcp.f32 %v522_v13 }
 0x3c6   : > { %v645_v46 = vpop.xlane.xlu1 %644  ;;  %v642_v47 = vpop.xlane.xlu0 %641 }
 0x3c7   : > { %1255 = vrcp.f32 %v645_v46 }
 0x3c8   : > { %1257 = vrcp.f32 %v642_v47 }
 0x3ca   : > { %v768_v48 = vpop.xlane.xlu1 %767  ;;  %v765_v49 = vpop.xlane.xlu0 %764 }
 0x3cb   : > { %1259 = vrcp.f32 %v768_v48 }
 0x3cc   : > { %1261 = vrcp.f32 %v765_v49 }
 0x3ce   : > { %v652_v57 = vpop.permute.xlu1 %651  ;;  %v775_v63 = vpop.permute.xlu0 %774 }
 0x3d0   : > { %v1254_v51 = vpop.eup %1253 }
 0x3d1   : > { %v526_v53 = vmul.f32 %v1254_v51, %v1238_v26 }
 0x3d3   : > { %v527_v54 = vpack.c.bf16 %v526_v53, %v525_v52 }
 0x3d4   : > { %v1256_v55 = vpop.eup %1255 }
 0x3d5   : > { %v1258_v56 = vpop.eup %1257  ;;  %1110 = vmatmul.mubr.msk.bf16.vlgmr.msra.gmra.mxu0 %vm381_vm3, %v527_v54  ;;  %v649_v59 = vmul.f32 %v1256_v55, %v1242_v29 }
 0x3d6   : > { %1120 = vmatpush3.bf16.msra.mxu0 %v652_v57  ;;  %1121 = vmatprep.mubr.msk.bf16.mxu0 %vm1419_vm0, %v1418_v0  ;;  %v648_v58 = vmul.f32 %v1258_v56, %v1240_v27 }
 0x3d7   : > { %1131 = vmatprep.subr.bf16.mxu0 %v1418_v0 }
 0x3d8   : > { %v1260_v60 = vpop.eup %1259  ;;  %v650_v61 = vpack.c.bf16 %v649_v59, %v648_v58 }
 0x3d9   : > { %v1262_v62 = vpop.eup %1261  ;;  %v772_v2 = vmul.f32 %v1260_v60, %v1246_v33 }
 0x3da   : > { %v771_v1 = vmul.f32 %v1262_v62, %v1674_v30 }
 0x3dc   : > { %v773_v3 = vpack.c.bf16 %v772_v2, %v771_v1 }
 0x3dd   : > { %1122 = vmatmul.mubr.msk.bf16.vlgmr.msra.gmra.mxu0 %vm381_vm3, %v650_v61 }
 0x3de   : > { %1132 = vmatpush3.bf16.msra.mxu0 %v775_v63  ;;  %1133 = vmatprep.mubr.msk.bf16.mxu0 %vm1419_vm0, %v1418_v0 }
 0x3e5   : > { %1134 = vmatmul.mubr.msk.bf16.vlgmr.msra.gmra.mxu0 %vm381_vm3, %v773_v3 }
 0x460   : > { %v445_v4 = vpop.f32.mrf.mxu0 }
 0x462   : > { %v1099_v5 = vpop.f32.mrf.mxu0 }
 0x464   : > { %v448_v6 = vpop.f32.mrf.mxu0 }
 0x466   : > { %v1100_v7 = vpop.f32.mrf.mxu0 }
 0x495   : > { %v568_v8 = vpop.f32.mrf.mxu0 }
 0x496   : > { %823 = vrot.lane.b32.xlu1 %v568_v8, %s1431_s16 }
 0x497   : > { %v1111_v9 = vpop.f32.mrf.mxu0 }
 0x499   : > { %v571_v10 = vpop.f32.mrf.mxu0 }
 0x49a   : > { %825 = vrot.lane.b32.xlu0 %v571_v10, %s1431_s16 }
 0x49b   : > { %v1112_v15 = vpop.f32.mrf.mxu0 }
 0x49d   : > { %v691_v16 = vpop.f32.mrf.mxu0 }
 0x49e   : > { %831 = vrot.lane.b32.xlu1 %v691_v16, %s1432_s29 }
 0x49f   : > { %v1123_v20 = vpop.f32.mrf.mxu0 }
 0x4a1   : > { %v694_v21 = vpop.f32.mrf.mxu0 }
 0x4a2   : > { %833 = vrot.lane.b32.xlu0 %v694_v21, %s1432_s29  ;;  %s1347_s29 = sshll.u32 %s1434_s22, 4  ;;  %s1348_s29 = int_to_ptr.vmem [resolvable:$false] %s1347_s29 }
 0x4a3   : > { %v1124_v22 = vpop.f32.mrf.mxu0  ;;  %p1350_p13 = scmp.lt.s32.totalorder %s1716_s14, %s1348_s29 }
 0x4a5   : > { %v814_v23 = vpop.f32.mrf.mxu0 }
 0x4a6   : > { %839 = vrot.lane.b32.xlu1 %v814_v23, %s1433_s13 }
 0x4a7   : > { %v1135_v24 = vpop.f32.mrf.mxu0 }
 0x4a9   : > { %v817_v25 = vpop.f32.mrf.mxu0 }
 0x4aa   : > { %841 = vrot.lane.b32.xlu0 %v817_v25, %s1433_s13  ;;  %s1349_s13 = scalar_lea.vmem %s1348_s29, 512 }
 0x4ab   : > { %v1136_v26 = vpop.f32.mrf.mxu0  ;;  %p1351_p0 = scmp.lt.s32.totalorder %s1349_s13, %s1343_s17 }
 0x4ad   : > { %p1352_p10 = por %p1351_p0, %p1350_p13 }
 0x4af   : > { %p1353_p3 = pnand %p1352_p10, %p1346_p12 }
 0x508   : > { %v824_v27 = vpop.permute.xlu1 %823 }
 0x509   : > { %v845_v31 = vsel %vm331_vm2, %v445_v4, %v824_v27 }
 0x50c   : > { %v826_v28 = vpop.permute.xlu0 %825 }
 0x50d   : > { %v846_v33 = vsel %vm331_vm2, %v448_v6, %v826_v28 }
 0x510   : > { %v832_v0 = vpop.permute.xlu1 %831 }
 0x511   : > { %v847_v32 = vsel %vm381_vm3, %v845_v31, %v832_v0 }
 0x514   : > { %v834_v29 = vpop.permute.xlu0 %833 }
 0x515   : > { %v848_v36 = vsel %vm381_vm3, %v846_v33, %v834_v29 }
 0x518   : > { %v840_v30 = vpop.permute.xlu1 %839 }
 0x519   : > { %v850_v35 = vsel %vm849_vm4, %v847_v32, %v840_v30 }
 0x51a   : > { %v859_v39 = vmul.f32 %v1049_v34, %v850_v35 }
 0x51c   : > { %v842_v37 = vpop.permute.xlu0 %841 }
 0x51d   : > { %v851_v38 = vsel %vm849_vm4, %v848_v36, %v842_v37 }
 0x51e   : > { %v860_v40 = vmul.f32 %v1049_v34, %v851_v38 }
 0x520   : > { %v861_v41 = vpack.c.bf16 %v860_v40, %v859_v39 }
 0x522   : > { %1142 = vmatmul.mubr.msk.bf16.vlgmr.msra.gmra.mxu1 %vm282_vm1, %v861_v41 }
 0x5e2   : > { %v912_v43 = vpop.f32.mrf.mxu1 }
 0x5e3   : > { %v913_v44 = vadd.f32 %v1050_v42, %v912_v43 }
 0x5e4   : > { %v1143_v45 = vpop.f32.mrf.mxu1 }
 0x5e5   : > { %919 = vst.msk [vmem:[%s271_s12] sm:$0xff] %vm282_vm1, %v913_v44 }
 0x5e6   : > { %v915_v13 = vpop.f32.mrf.mxu1 }
 0x5e7   : > { %v916_v46 = vadd.f32 %v1050_v42, %v915_v13 }
 0x5e8   : > { %v1144_v47 = vpop.f32.mrf.mxu1 }
 0x5e9   : > { %920 = vst.msk [vmem:[%s271_s12 + $0x8] sm:$0xff] %vm282_vm1, %v916_v46 }
 0x5ea   : > { %1356 = shalt.err (!%p1353_p3)
}
 0x5eb   : > { %s1357_s24 = scalar_lea.hbm %s1721_s11, 256  ;;  %s1361_s10 = scalar_lea.hbm %s1771_s5, 512 }
 0x5ec   : > { %p1358_p11 = scmp.ne.s32.totalorder %s1721_s11, %s1357_s24  ;;  %p1362_p4 = scmp.lt.s32.totalorder %s1721_s11, %s1771_s5 }
 0x5ed   : > { %p1363_p6 = scmp.lt.s32.totalorder %s1361_s10, %s1357_s24 }
 0x5ee   : > { %p1359_p9 = pnand %p1358_p11, %p1788_p2 }
 0x5ef   : > { %p1364_p8 = por %p1363_p6, %p1362_p4 }
 0x5f0   : > { %p1360_p1 = pneg %p1359_p9 }
 0x5f2   : > { %p1365_p5 = pnand %p1364_p8, %p1360_p1 }
 0x5f4   : > { %1368 = shalt.err (!%p1365_p5)
}
 0x5f5   : > { %s1435_s7 = smov 128  }
 0x5f6   : > { %1155 = dma.vmem_to_hbm [thread:$0]  (%p1788_p2), %s1716_s14, 256, %s1721_s11, %s922_s8, %s1435_s7, %s1435_s7, %s1431_s16  }
 0x5f7 PF: > { %s950_s28 = sand.u32 1, %s1399_s18   ;;  %p1789_p7 = scmp.ne.s32.totalorder %s1778_s25, 0 }
 0x5f8   : > { %p1790_p12 = scmp.ge.s32.totalorder %s1411_s21, 2  ;;  %s951_s17 = scalar_lea.sflag [#allocation4], %s950_s28 }
 0x5fa   : > { %p1169_p13 = pnand %p1790_p12, %p1789_p7 }
 0x5fc   : > { %p1170_p0 = pneg %p1169_p13 }
 0x5fe   : > { %1394 = dma.done.wait (%p1170_p0), %s951_s17, 256  }
 0x5ff   : > { %1396 = vsyncadd (%p1170_p0), %s951_s17, 4294967040  ;;  %p19_p10 = scmp.ge.s32.totalorder %s1544_s15, 4   ;;  %s1791_s18 = smov %s1403_s19 }
 0x600   : > { %s1792_s19 = smov %s1407_s20  ;;  %s1793_s20 = smov %s1560_s27 }
 0x601   : > { %s1794_s21 = smov %s1544_s15  ;;  %21 = sbr.rel (!%p19_p10) target bundleno = 6 (0x6), region = 93 }
 0x606   :  { %956 = vsyncpa [#allocation3], 1 }
 0x607   :  { %958 = vsyncpa [#allocation3 + $0x1], 1 }
 0x608   :  { %959 = vsyncpa [#allocation6], 1 }
 0x609   :  { %960 = vsyncpa [#allocation4], 1 }
 0x60a   :  { %962 = vsyncpa [#allocation4 + $0x1], 1 }

</bundles_post_ra>
